<compile_context>
chip_gen: v5e
topology: v5e:2x2
jax: 0.10.0
libtpu: 0.0.40
codegen_flags: <defaults>
</compile_context>

<pallas_src>
import functools

import jax
import jax.numpy as jnp
from jax.experimental import pallas as pl
from jax.experimental.pallas import tpu as pltpu


def _policy_kernel(gx_ref, mask_ref, whh_ref, wout_ref, bout_ref,
                   probs_ref, h_ref, c_ref):
    """LSTM recurrence over T steps (input projection precomputed) + linear + softmax."""
    T, B, _G = gx_ref.shape
    H = whh_ref.shape[0]

    h0 = jnp.zeros((B, H), jnp.bfloat16)   # h carried in bf16 (MXU operand dtype)
    c0 = jnp.zeros((B, H), jnp.float32)    # c stays f32

    def step(t, carry):
        h, c = carry
        # Only the recurrent matmul stays on the serial critical path:
        # (B,H)x(H,4H) bf16 with f32 accumulation -> one MXU column pass.
        # W_hh is read from VMEM here on purpose (2 vregs at H=32; no hoist / no spill).
        gates = gx_ref[t].astype(jnp.float32) + jnp.dot(
            h, whh_ref[...], preferred_element_type=jnp.float32)          # (B, 4H) f32
        # Gate order [i, f, g, o] (torch.nn.LSTM).
        i_g = jax.nn.sigmoid(gates[:, 0 * H:1 * H])
        f_g = jax.nn.sigmoid(gates[:, 1 * H:2 * H])
        g_g = jnp.tanh(gates[:, 2 * H:3 * H])
        o_g = jax.nn.sigmoid(gates[:, 3 * H:4 * H])
        c_new = f_g * c + i_g * g_g
        h_new = (o_g * jnp.tanh(c_new)).astype(jnp.bfloat16)
        # pack_padded_sequence emulation: state only advances while t < seq_len[b].
        # Mask is pre-broadcast to (B,H) per step -> no lane broadcast on the chain.
        valid = mask_ref[t] != 0.0
        return (jnp.where(valid, h_new, h), jnp.where(valid, c_new, c))

    # T is static and tiny -> full unroll gives the scheduler the whole chain.
    h, c = jax.lax.fori_loop(0, T, step, (h0, c0), unroll=True)

    # enc2out + softmax(dim=1), off the serial path; exact normalization.
    hf = h.astype(jnp.float32)
    logits = jnp.dot(hf, wout_ref[...], preferred_element_type=jnp.float32) + bout_ref[...]
    m = jnp.max(logits, axis=1, keepdims=True)
    e = jnp.exp(logits - m)
    probs_ref[...] = e / jnp.sum(e, axis=1, keepdims=True)
    h_ref[...] = hf
    c_ref[...] = c


def policy_forward_pallas(seq_idx, seq_len, params, *, recom, evaluate=False,
                          sample_key=None):
    """Mirrors Policy.forward((seq, seq_len)) for model='LSTM'.

    seq_idx : (T, B) int32 token ids
    seq_len : (B,)   int32 valid lengths
    Returns (output, indices, (h, c)) with output (B, C), indices (B, recom),
    h/c (1, B, H) -- matching the PyTorch module.
    """
    emb_table = params["embedding"]        # (C, E)
    w_ih = params["w_ih"]                  # (E, 4H)
    w_hh = params["w_hh"]                  # (H, 4H)
    b = params["b"]                        # (1, 4H)  (= b_ih + b_hh)
    w_out = params["w_out"]                # (H, C)
    b_out = params["b_out"]                # (1, C)

    T, B = seq_idx.shape
    H = w_hh.shape[0]
    C = w_out.shape[1]

    # ---- Glue (outside the serial region): embedding gather + input projection + bias.
    seq_em = jnp.take(emb_table, seq_idx, axis=0).astype(jnp.float32)          # (T, B, E)
    gates_x = (jnp.einsum("tbe,eg->tbg", seq_em, w_ih.astype(jnp.float32)) + b
               ).astype(jnp.bfloat16)                                          # (T, B, 4H)

    # Validity mask, pre-broadcast over H so the kernel never lane-broadcasts per step.
    t_ids = jnp.arange(T, dtype=jnp.int32)[:, None]                            # (T, 1)
    mask = (t_ids < seq_len[None, :].astype(jnp.int32)).astype(jnp.float32)    # (T, B)
    mask = jnp.broadcast_to(mask[:, :, None], (T, B, H))                       # (T, B, H)

    w_hh_bf = w_hh.astype(jnp.bfloat16)                                        # (H, 4H)

    full = lambda shape: pl.BlockSpec(shape, lambda i: (0,) * len(shape))

    probs, h_last, c_last = pl.pallas_call(
        _policy_kernel,
        out_shape=(
            jax.ShapeDtypeStruct((B, C), jnp.float32),
            jax.ShapeDtypeStruct((B, H), jnp.float32),
            jax.ShapeDtypeStruct((B, H), jnp.float32),
        ),
        grid=(1,),
        in_specs=[
            full((T, B, 4 * H)),    # gates_x (bf16)
            full((T, B, H)),        # validity mask (f32, pre-broadcast)
            full((H, 4 * H)),       # W_hh (bf16)
            full((H, C)),           # W_out (f32)
            full((1, C)),           # b_out (f32)
        ],
        out_specs=(
            full((B, C)),
            full((B, H)),
            full((B, H)),
        ),
        compiler_params=pltpu.CompilerParams(dimension_semantics=("arbitrary",)),
    )(gates_x, mask, w_hh_bf, w_out.astype(jnp.float32), b_out.astype(jnp.float32))

    if evaluate:
        # torch.topk(output, recom, dim=1)
        _, indices = jax.lax.top_k(probs, recom)
    else:
        # torch.multinomial(output, recom) -> sample `recom` classes WITHOUT replacement;
        # equivalent to Gumbel-top-k on log-probs (glue, not hot path).
        assert sample_key is not None
        gumbel = -jnp.log(-jnp.log(
            jax.random.uniform(sample_key, probs.shape, minval=1e-20, maxval=1.0)))
        _, indices = jax.lax.top_k(jnp.log(probs + 1e-20) + gumbel, recom)

    h = h_last[None]   # (1, B, H), matching torch (num_layers, B, H)
    c = c_last[None]
    return probs, indices, (h, c)


def policy_reference(seq_idx, seq_len, params):
    """Pure-JAX f32 reference of the same forward (for correctness checking)."""
    emb = params["embedding"]
    w_ih, w_hh, b = params["w_ih"], params["w_hh"], params["b"]
    w_out, b_out = params["w_out"], params["b_out"]
    T, B = seq_idx.shape
    H = w_hh.shape[0]

    seq_em = jnp.take(emb, seq_idx, axis=0)                 # (T, B, E)
    h = jnp.zeros((B, H), jnp.float32)
    c = jnp.zeros((B, H), jnp.float32)
    for t in range(T):
        gates = seq_em[t] @ w_ih + b + h @ w_hh
        i_g = jax.nn.sigmoid(gates[:, 0 * H:1 * H])
        f_g = jax.nn.sigmoid(gates[:, 1 * H:2 * H])
        g_g = jnp.tanh(gates[:, 2 * H:3 * H])
        o_g = jax.nn.sigmoid(gates[:, 3 * H:4 * H])
        c_new = f_g * c + i_g * g_g
        h_new = o_g * jnp.tanh(c_new)
        valid = (t < seq_len)[:, None]
        h = jnp.where(valid, h_new, h)
        c = jnp.where(valid, c_new, c)
    logits = h @ w_out + b_out
    probs = jax.nn.softmax(logits, axis=1)
    return probs, h, c


def make_params(key, numlabel, embed_dim, encod_dim):
    """Deterministic synthetic parameter init (shapes from Policy.__init__)."""
    ks = jax.random.split(key, 6)
    scale = 0.1
    return {
        "embedding": scale * jax.random.normal(ks[0], (numlabel, embed_dim), jnp.float32),
        "w_ih": scale * jax.random.normal(ks[1], (embed_dim, 4 * encod_dim), jnp.float32),
        "w_hh": scale * jax.random.normal(ks[2], (encod_dim, 4 * encod_dim), jnp.float32),
        "b": scale * jax.random.normal(ks[3], (1, 4 * encod_dim), jnp.float32),
        "w_out": scale * jax.random.normal(ks[4], (encod_dim, numlabel), jnp.float32),
        "b_out": scale * jax.random.normal(ks[5], (1, numlabel), jnp.float32),
    }


if __name__ == "__main__":
    # Small shapes consistent with the module: batch=8, embed=32, hidden=32,
    # numlabel(classes/vocab)=128, seq_len<=6, recom=5.
    T, B, E, H, C, RECOM = 6, 8, 32, 32, 128, 5

    key = jax.random.PRNGKey(0)
    k_par, k_seq, k_len, k_samp = jax.random.split(key, 4)

    params = make_params(k_par, numlabel=C, embed_dim=E, encod_dim=H)
    seq_idx = jax.random.randint(k_seq, (T, B), 0, C, dtype=jnp.int32)
    seq_len = jax.random.randint(k_len, (B,), 3, T + 1, dtype=jnp.int32)

    fwd = functools.partial(policy_forward_pallas, recom=RECOM)
    probs, indices, (h, c) = fwd(seq_idx, seq_len, params,
                                 evaluate=False, sample_key=k_samp)
    jax.block_until_ready((probs, indices, h, c))

    assert probs.shape == (B, C)
    assert indices.shape == (B, RECOM)
    assert h.shape == (1, B, H) and c.shape == (1, B, H)
    # Softmax rows must sum to ~1 (exact normalization -> tight).
    assert bool(jnp.allclose(jnp.sum(probs, axis=1), 1.0, atol=1e-3))
    assert bool(jnp.all(probs >= 0.0))

    # Cross-check against the pure-JAX f32 reference (kernel uses bf16 on the
    # recurrent path, hence generous-but-safe tolerances).
    probs_r, h_r, c_r = policy_reference(seq_idx, seq_len, params)
    assert bool(jnp.allclose(probs, probs_r, atol=3e-3))
    assert bool(jnp.allclose(h[0], h_r, atol=2e-2))
    assert bool(jnp.allclose(c[0], c_r, atol=2e-2))

    # Also exercise the evaluate=True (top-k) branch.
    probs_e, idx_e, _ = fwd(seq_idx, seq_len, params, evaluate=True)
    jax.block_until_ready((probs_e, idx_e))
    assert idx_e.shape == (B, RECOM)

    print("KERNEL_OK")
</pallas_src>

<mosaic_0001>
module attributes {stable_mosaic.version = 11 : i64} {
  func.func @_policy_kernel(%arg0: i32, %arg1: memref<6x8x128xbf16, #tpu.memory_space<vmem>>, %arg2: memref<6x8x32xf32, #tpu.memory_space<vmem>>, %arg3: memref<32x128xbf16, #tpu.memory_space<vmem>>, %arg4: memref<32x128xf32, #tpu.memory_space<vmem>>, %arg5: memref<1x128xf32, #tpu.memory_space<vmem>>, %arg6: memref<8x128xf32, #tpu.memory_space<vmem>>, %arg7: memref<8x32xf32, #tpu.memory_space<vmem>>, %arg8: memref<8x32xf32, #tpu.memory_space<vmem>>) attributes {dimension_semantics = [#tpu.dimension_semantics<arbitrary>], iteration_bounds = array<i64: 1>, scalar_prefetch = 0 : i64, scratch_operands = 0 : i64, tpu.core_type = #tpu.core_type<tc>, window_params = [{pipeline_mode = #tpu.pipeline_mode<synchronous>, transform_indices = @transform_0, window_bounds = array<i64: 6, 8, 128>}, {pipeline_mode = #tpu.pipeline_mode<synchronous>, transform_indices = @transform_1, window_bounds = array<i64: 6, 8, 32>}, {pipeline_mode = #tpu.pipeline_mode<synchronous>, transform_indices = @transform_2, window_bounds = array<i64: 32, 128>}, {pipeline_mode = #tpu.pipeline_mode<synchronous>, transform_indices = @transform_3, window_bounds = array<i64: 32, 128>}, {pipeline_mode = #tpu.pipeline_mode<synchronous>, transform_indices = @transform_4, window_bounds = array<i64: 1, 128>}, {pipeline_mode = #tpu.pipeline_mode<synchronous>, transform_indices = @transform_5, window_bounds = array<i64: 8, 128>}, {pipeline_mode = #tpu.pipeline_mode<synchronous>, transform_indices = @transform_6, window_bounds = array<i64: 8, 32>}, {pipeline_mode = #tpu.pipeline_mode<synchronous>, transform_indices = @transform_7, window_bounds = array<i64: 8, 32>}]} {
    %cst = arith.constant 0.000000e+00 : bf16
    %0 = vector.broadcast %cst : bf16 to vector<8x32xbf16>
    %cst_0 = arith.constant 0.000000e+00 : f32
    %1 = vector.broadcast %cst_0 : f32 to vector<8x32xf32>
    %c0_i32 = arith.constant 0 : i32
    %2 = arith.index_cast %c0_i32 : i32 to index
    %c0 = arith.constant 0 : index
    %c0_1 = arith.constant 0 : index
    %3 = vector.load %arg1[%2, %c0, %c0_1] : memref<6x8x128xbf16, #tpu.memory_space<vmem>>, vector<1x8x128xbf16>
    %4 = vector.shape_cast %3 : vector<1x8x128xbf16> to vector<8x128xbf16>
    %5 = arith.extf %4 : vector<8x128xbf16> to vector<8x128xf32>
    %c0_2 = arith.constant 0 : index
    %c0_3 = arith.constant 0 : index
    %6 = vector.load %arg3[%c0_2, %c0_3] : memref<32x128xbf16, #tpu.memory_space<vmem>>, vector<32x128xbf16>
    %cst_4 = arith.constant dense<0.000000e+00> : vector<8x128xf32>
    %7 = tpu.matmul %0, %6, %cst_4 {dimension_numbers = #tpu.dot_dimension_numbers<[1], [0], [0], [1], [0, 0, 1, 1], [], []>} : vector<8x32xbf16>, vector<32x128xbf16>, vector<8x128xf32> -> vector<8x128xf32>
    %8 = arith.addf %5, %7 : vector<8x128xf32>
    %9 = vector.extract_strided_slice %8 {offsets = [0, 0], sizes = [8, 32], strides = [1, 1]} : vector<8x128xf32> to vector<8x32xf32>
    %10 = arith.negf %9 : vector<8x32xf32>
    %11 = math.exp %10 : vector<8x32xf32>
    %cst_5 = arith.constant 1.000000e+00 : f32
    %12 = vector.broadcast %cst_5 : f32 to vector<8x32xf32>
    %13 = arith.addf %12, %11 : vector<8x32xf32>
    %14 = arith.divf %12, %13 : vector<8x32xf32>
    %15 = vector.extract_strided_slice %8 {offsets = [0, 32], sizes = [8, 32], strides = [1, 1]} : vector<8x128xf32> to vector<8x32xf32>
    %16 = arith.negf %15 : vector<8x32xf32>
    %17 = math.exp %16 : vector<8x32xf32>
    %cst_6 = arith.constant 1.000000e+00 : f32
    %18 = vector.broadcast %cst_6 : f32 to vector<8x32xf32>
    %19 = arith.addf %18, %17 : vector<8x32xf32>
    %20 = arith.divf %18, %19 : vector<8x32xf32>
    %21 = vector.extract_strided_slice %8 {offsets = [0, 64], sizes = [8, 32], strides = [1, 1]} : vector<8x128xf32> to vector<8x32xf32>
    %22 = math.tanh %21 : vector<8x32xf32>
    %23 = vector.extract_strided_slice %8 {offsets = [0, 96], sizes = [8, 32], strides = [1, 1]} : vector<8x128xf32> to vector<8x32xf32>
    %24 = arith.negf %23 : vector<8x32xf32>
    %25 = math.exp %24 : vector<8x32xf32>
    %cst_7 = arith.constant 1.000000e+00 : f32
    %26 = vector.broadcast %cst_7 : f32 to vector<8x32xf32>
    %27 = arith.addf %26, %25 : vector<8x32xf32>
    %28 = arith.divf %26, %27 : vector<8x32xf32>
    %29 = arith.mulf %20, %1 : vector<8x32xf32>
    %30 = arith.mulf %14, %22 : vector<8x32xf32>
    %31 = arith.addf %29, %30 : vector<8x32xf32>
    %32 = math.tanh %31 : vector<8x32xf32>
    %33 = arith.mulf %28, %32 : vector<8x32xf32>
    %34 = arith.truncf %33 : vector<8x32xf32> to vector<8x32xbf16>
    %35 = arith.index_cast %c0_i32 : i32 to index
    %c0_8 = arith.constant 0 : index
    %c0_9 = arith.constant 0 : index
    %36 = vector.load %arg2[%35, %c0_8, %c0_9] : memref<6x8x32xf32, #tpu.memory_space<vmem>>, vector<1x8x32xf32>
    %37 = vector.shape_cast %36 : vector<1x8x32xf32> to vector<8x32xf32>
    %cst_10 = arith.constant 0.000000e+00 : f32
    %38 = vector.broadcast %cst_10 : f32 to vector<8x32xf32>
    %39 = arith.cmpf one, %37, %38 : vector<8x32xf32>
    %40 = arith.select %39, %34, %0 : vector<8x32xi1>, vector<8x32xbf16>
    %41 = arith.select %39, %31, %1 : vector<8x32xi1>, vector<8x32xf32>
    %c1_i32 = arith.constant 1 : i32
    %42 = arith.index_cast %c1_i32 : i32 to index
    %c0_11 = arith.constant 0 : index
    %c0_12 = arith.constant 0 : index
    %43 = vector.load %arg1[%42, %c0_11, %c0_12] : memref<6x8x128xbf16, #tpu.memory_space<vmem>>, vector<1x8x128xbf16>
    %44 = vector.shape_cast %43 : vector<1x8x128xbf16> to vector<8x128xbf16>
    %45 = arith.extf %44 : vector<8x128xbf16> to vector<8x128xf32>
    %c0_13 = arith.constant 0 : index
    %c0_14 = arith.constant 0 : index
    %46 = vector.load %arg3[%c0_13, %c0_14] : memref<32x128xbf16, #tpu.memory_space<vmem>>, vector<32x128xbf16>
    %cst_15 = arith.constant dense<0.000000e+00> : vector<8x128xf32>
    %47 = tpu.matmul %40, %46, %cst_15 {dimension_numbers = #tpu.dot_dimension_numbers<[1], [0], [0], [1], [0, 0, 1, 1], [], []>} : vector<8x32xbf16>, vector<32x128xbf16>, vector<8x128xf32> -> vector<8x128xf32>
    %48 = arith.addf %45, %47 : vector<8x128xf32>
    %49 = vector.extract_strided_slice %48 {offsets = [0, 0], sizes = [8, 32], strides = [1, 1]} : vector<8x128xf32> to vector<8x32xf32>
    %50 = arith.negf %49 : vector<8x32xf32>
    %51 = math.exp %50 : vector<8x32xf32>
    %cst_16 = arith.constant 1.000000e+00 : f32
    %52 = vector.broadcast %cst_16 : f32 to vector<8x32xf32>
    %53 = arith.addf %52, %51 : vector<8x32xf32>
    %54 = arith.divf %52, %53 : vector<8x32xf32>
    %55 = vector.extract_strided_slice %48 {offsets = [0, 32], sizes = [8, 32], strides = [1, 1]} : vector<8x128xf32> to vector<8x32xf32>
    %56 = arith.negf %55 : vector<8x32xf32>
    %57 = math.exp %56 : vector<8x32xf32>
    %cst_17 = arith.constant 1.000000e+00 : f32
    %58 = vector.broadcast %cst_17 : f32 to vector<8x32xf32>
    %59 = arith.addf %58, %57 : vector<8x32xf32>
    %60 = arith.divf %58, %59 : vector<8x32xf32>
    %61 = vector.extract_strided_slice %48 {offsets = [0, 64], sizes = [8, 32], strides = [1, 1]} : vector<8x128xf32> to vector<8x32xf32>
    %62 = math.tanh %61 : vector<8x32xf32>
    %63 = vector.extract_strided_slice %48 {offsets = [0, 96], sizes = [8, 32], strides = [1, 1]} : vector<8x128xf32> to vector<8x32xf32>
    %64 = arith.negf %63 : vector<8x32xf32>
    %65 = math.exp %64 : vector<8x32xf32>
    %cst_18 = arith.constant 1.000000e+00 : f32
    %66 = vector.broadcast %cst_18 : f32 to vector<8x32xf32>
    %67 = arith.addf %66, %65 : vector<8x32xf32>
    %68 = arith.divf %66, %67 : vector<8x32xf32>
    %69 = arith.mulf %60, %41 : vector<8x32xf32>
    %70 = arith.mulf %54, %62 : vector<8x32xf32>
    %71 = arith.addf %69, %70 : vector<8x32xf32>
    %72 = math.tanh %71 : vector<8x32xf32>
    %73 = arith.mulf %68, %72 : vector<8x32xf32>
    %74 = arith.truncf %73 : vector<8x32xf32> to vector<8x32xbf16>
    %75 = arith.index_cast %c1_i32 : i32 to index
    %c0_19 = arith.constant 0 : index
    %c0_20 = arith.constant 0 : index
    %76 = vector.load %arg2[%75, %c0_19, %c0_20] : memref<6x8x32xf32, #tpu.memory_space<vmem>>, vector<1x8x32xf32>
    %77 = vector.shape_cast %76 : vector<1x8x32xf32> to vector<8x32xf32>
    %cst_21 = arith.constant 0.000000e+00 : f32
    %78 = vector.broadcast %cst_21 : f32 to vector<8x32xf32>
    %79 = arith.cmpf one, %77, %78 : vector<8x32xf32>
    %80 = arith.select %79, %74, %40 : vector<8x32xi1>, vector<8x32xbf16>
    %81 = arith.select %79, %71, %41 : vector<8x32xi1>, vector<8x32xf32>
    %c2_i32 = arith.constant 2 : i32
    %82 = arith.index_cast %c2_i32 : i32 to index
    %c0_22 = arith.constant 0 : index
    %c0_23 = arith.constant 0 : index
    %83 = vector.load %arg1[%82, %c0_22, %c0_23] : memref<6x8x128xbf16, #tpu.memory_space<vmem>>, vector<1x8x128xbf16>
    %84 = vector.shape_cast %83 : vector<1x8x128xbf16> to vector<8x128xbf16>
    %85 = arith.extf %84 : vector<8x128xbf16> to vector<8x128xf32>
    %c0_24 = arith.constant 0 : index
    %c0_25 = arith.constant 0 : index
    %86 = vector.load %arg3[%c0_24, %c0_25] : memref<32x128xbf16, #tpu.memory_space<vmem>>, vector<32x128xbf16>
    %cst_26 = arith.constant dense<0.000000e+00> : vector<8x128xf32>
    %87 = tpu.matmul %80, %86, %cst_26 {dimension_numbers = #tpu.dot_dimension_numbers<[1], [0], [0], [1], [0, 0, 1, 1], [], []>} : vector<8x32xbf16>, vector<32x128xbf16>, vector<8x128xf32> -> vector<8x128xf32>
    %88 = arith.addf %85, %87 : vector<8x128xf32>
    %89 = vector.extract_strided_slice %88 {offsets = [0, 0], sizes = [8, 32], strides = [1, 1]} : vector<8x128xf32> to vector<8x32xf32>
    %90 = arith.negf %89 : vector<8x32xf32>
    %91 = math.exp %90 : vector<8x32xf32>
    %cst_27 = arith.constant 1.000000e+00 : f32
    %92 = vector.broadcast %cst_27 : f32 to vector<8x32xf32>
    %93 = arith.addf %92, %91 : vector<8x32xf32>
    %94 = arith.divf %92, %93 : vector<8x32xf32>
    %95 = vector.extract_strided_slice %88 {offsets = [0, 32], sizes = [8, 32], strides = [1, 1]} : vector<8x128xf32> to vector<8x32xf32>
    %96 = arith.negf %95 : vector<8x32xf32>
    %97 = math.exp %96 : vector<8x32xf32>
    %cst_28 = arith.constant 1.000000e+00 : f32
    %98 = vector.broadcast %cst_28 : f32 to vector<8x32xf32>
    %99 = arith.addf %98, %97 : vector<8x32xf32>
    %100 = arith.divf %98, %99 : vector<8x32xf32>
    %101 = vector.extract_strided_slice %88 {offsets = [0, 64], sizes = [8, 32], strides = [1, 1]} : vector<8x128xf32> to vector<8x32xf32>
    %102 = math.tanh %101 : vector<8x32xf32>
    %103 = vector.extract_strided_slice %88 {offsets = [0, 96], sizes = [8, 32], strides = [1, 1]} : vector<8x128xf32> to vector<8x32xf32>
    %104 = arith.negf %103 : vector<8x32xf32>
    %105 = math.exp %104 : vector<8x32xf32>
    %cst_29 = arith.constant 1.000000e+00 : f32
    %106 = vector.broadcast %cst_29 : f32 to vector<8x32xf32>
    %107 = arith.addf %106, %105 : vector<8x32xf32>
    %108 = arith.divf %106, %107 : vector<8x32xf32>
    %109 = arith.mulf %100, %81 : vector<8x32xf32>
    %110 = arith.mulf %94, %102 : vector<8x32xf32>
    %111 = arith.addf %109, %110 : vector<8x32xf32>
    %112 = math.tanh %111 : vector<8x32xf32>
    %113 = arith.mulf %108, %112 : vector<8x32xf32>
    %114 = arith.truncf %113 : vector<8x32xf32> to vector<8x32xbf16>
    %115 = arith.index_cast %c2_i32 : i32 to index
    %c0_30 = arith.constant 0 : index
    %c0_31 = arith.constant 0 : index
    %116 = vector.load %arg2[%115, %c0_30, %c0_31] : memref<6x8x32xf32, #tpu.memory_space<vmem>>, vector<1x8x32xf32>
    %117 = vector.shape_cast %116 : vector<1x8x32xf32> to vector<8x32xf32>
    %cst_32 = arith.constant 0.000000e+00 : f32
    %118 = vector.broadcast %cst_32 : f32 to vector<8x32xf32>
    %119 = arith.cmpf one, %117, %118 : vector<8x32xf32>
    %120 = arith.select %119, %114, %80 : vector<8x32xi1>, vector<8x32xbf16>
    %121 = arith.select %119, %111, %81 : vector<8x32xi1>, vector<8x32xf32>
    %c3_i32 = arith.constant 3 : i32
    %122 = arith.index_cast %c3_i32 : i32 to index
    %c0_33 = arith.constant 0 : index
    %c0_34 = arith.constant 0 : index
    %123 = vector.load %arg1[%122, %c0_33, %c0_34] : memref<6x8x128xbf16, #tpu.memory_space<vmem>>, vector<1x8x128xbf16>
    %124 = vector.shape_cast %123 : vector<1x8x128xbf16> to vector<8x128xbf16>
    %125 = arith.extf %124 : vector<8x128xbf16> to vector<8x128xf32>
    %c0_35 = arith.constant 0 : index
    %c0_36 = arith.constant 0 : index
    %126 = vector.load %arg3[%c0_35, %c0_36] : memref<32x128xbf16, #tpu.memory_space<vmem>>, vector<32x128xbf16>
    %cst_37 = arith.constant dense<0.000000e+00> : vector<8x128xf32>
    %127 = tpu.matmul %120, %126, %cst_37 {dimension_numbers = #tpu.dot_dimension_numbers<[1], [0], [0], [1], [0, 0, 1, 1], [], []>} : vector<8x32xbf16>, vector<32x128xbf16>, vector<8x128xf32> -> vector<8x128xf32>
    %128 = arith.addf %125, %127 : vector<8x128xf32>
    %129 = vector.extract_strided_slice %128 {offsets = [0, 0], sizes = [8, 32], strides = [1, 1]} : vector<8x128xf32> to vector<8x32xf32>
    %130 = arith.negf %129 : vector<8x32xf32>
    %131 = math.exp %130 : vector<8x32xf32>
    %cst_38 = arith.constant 1.000000e+00 : f32
    %132 = vector.broadcast %cst_38 : f32 to vector<8x32xf32>
    %133 = arith.addf %132, %131 : vector<8x32xf32>
    %134 = arith.divf %132, %133 : vector<8x32xf32>
    %135 = vector.extract_strided_slice %128 {offsets = [0, 32], sizes = [8, 32], strides = [1, 1]} : vector<8x128xf32> to vector<8x32xf32>
    %136 = arith.negf %135 : vector<8x32xf32>
    %137 = math.exp %136 : vector<8x32xf32>
    %cst_39 = arith.constant 1.000000e+00 : f32
    %138 = vector.broadcast %cst_39 : f32 to vector<8x32xf32>
    %139 = arith.addf %138, %137 : vector<8x32xf32>
    %140 = arith.divf %138, %139 : vector<8x32xf32>
    %141 = vector.extract_strided_slice %128 {offsets = [0, 64], sizes = [8, 32], strides = [1, 1]} : vector<8x128xf32> to vector<8x32xf32>
    %142 = math.tanh %141 : vector<8x32xf32>
    %143 = vector.extract_strided_slice %128 {offsets = [0, 96], sizes = [8, 32], strides = [1, 1]} : vector<8x128xf32> to vector<8x32xf32>
    %144 = arith.negf %143 : vector<8x32xf32>
    %145 = math.exp %144 : vector<8x32xf32>
    %cst_40 = arith.constant 1.000000e+00 : f32
    %146 = vector.broadcast %cst_40 : f32 to vector<8x32xf32>
    %147 = arith.addf %146, %145 : vector<8x32xf32>
    %148 = arith.divf %146, %147 : vector<8x32xf32>
    %149 = arith.mulf %140, %121 : vector<8x32xf32>
    %150 = arith.mulf %134, %142 : vector<8x32xf32>
    %151 = arith.addf %149, %150 : vector<8x32xf32>
    %152 = math.tanh %151 : vector<8x32xf32>
    %153 = arith.mulf %148, %152 : vector<8x32xf32>
    %154 = arith.truncf %153 : vector<8x32xf32> to vector<8x32xbf16>
    %155 = arith.index_cast %c3_i32 : i32 to index
    %c0_41 = arith.constant 0 : index
    %c0_42 = arith.constant 0 : index
    %156 = vector.load %arg2[%155, %c0_41, %c0_42] : memref<6x8x32xf32, #tpu.memory_space<vmem>>, vector<1x8x32xf32>
    %157 = vector.shape_cast %156 : vector<1x8x32xf32> to vector<8x32xf32>
    %cst_43 = arith.constant 0.000000e+00 : f32
    %158 = vector.broadcast %cst_43 : f32 to vector<8x32xf32>
    %159 = arith.cmpf one, %157, %158 : vector<8x32xf32>
    %160 = arith.select %159, %154, %120 : vector<8x32xi1>, vector<8x32xbf16>
    %161 = arith.select %159, %151, %121 : vector<8x32xi1>, vector<8x32xf32>
    %c4_i32 = arith.constant 4 : i32
    %162 = arith.index_cast %c4_i32 : i32 to index
    %c0_44 = arith.constant 0 : index
    %c0_45 = arith.constant 0 : index
    %163 = vector.load %arg1[%162, %c0_44, %c0_45] : memref<6x8x128xbf16, #tpu.memory_space<vmem>>, vector<1x8x128xbf16>
    %164 = vector.shape_cast %163 : vector<1x8x128xbf16> to vector<8x128xbf16>
    %165 = arith.extf %164 : vector<8x128xbf16> to vector<8x128xf32>
    %c0_46 = arith.constant 0 : index
    %c0_47 = arith.constant 0 : index
    %166 = vector.load %arg3[%c0_46, %c0_47] : memref<32x128xbf16, #tpu.memory_space<vmem>>, vector<32x128xbf16>
    %cst_48 = arith.constant dense<0.000000e+00> : vector<8x128xf32>
    %167 = tpu.matmul %160, %166, %cst_48 {dimension_numbers = #tpu.dot_dimension_numbers<[1], [0], [0], [1], [0, 0, 1, 1], [], []>} : vector<8x32xbf16>, vector<32x128xbf16>, vector<8x128xf32> -> vector<8x128xf32>
    %168 = arith.addf %165, %167 : vector<8x128xf32>
    %169 = vector.extract_strided_slice %168 {offsets = [0, 0], sizes = [8, 32], strides = [1, 1]} : vector<8x128xf32> to vector<8x32xf32>
    %170 = arith.negf %169 : vector<8x32xf32>
    %171 = math.exp %170 : vector<8x32xf32>
    %cst_49 = arith.constant 1.000000e+00 : f32
    %172 = vector.broadcast %cst_49 : f32 to vector<8x32xf32>
    %173 = arith.addf %172, %171 : vector<8x32xf32>
    %174 = arith.divf %172, %173 : vector<8x32xf32>
    %175 = vector.extract_strided_slice %168 {offsets = [0, 32], sizes = [8, 32], strides = [1, 1]} : vector<8x128xf32> to vector<8x32xf32>
    %176 = arith.negf %175 : vector<8x32xf32>
    %177 = math.exp %176 : vector<8x32xf32>
    %cst_50 = arith.constant 1.000000e+00 : f32
    %178 = vector.broadcast %cst_50 : f32 to vector<8x32xf32>
    %179 = arith.addf %178, %177 : vector<8x32xf32>
    %180 = arith.divf %178, %179 : vector<8x32xf32>
    %181 = vector.extract_strided_slice %168 {offsets = [0, 64], sizes = [8, 32], strides = [1, 1]} : vector<8x128xf32> to vector<8x32xf32>
    %182 = math.tanh %181 : vector<8x32xf32>
    %183 = vector.extract_strided_slice %168 {offsets = [0, 96], sizes = [8, 32], strides = [1, 1]} : vector<8x128xf32> to vector<8x32xf32>
    %184 = arith.negf %183 : vector<8x32xf32>
    %185 = math.exp %184 : vector<8x32xf32>
    %cst_51 = arith.constant 1.000000e+00 : f32
    %186 = vector.broadcast %cst_51 : f32 to vector<8x32xf32>
    %187 = arith.addf %186, %185 : vector<8x32xf32>
    %188 = arith.divf %186, %187 : vector<8x32xf32>
    %189 = arith.mulf %180, %161 : vector<8x32xf32>
    %190 = arith.mulf %174, %182 : vector<8x32xf32>
    %191 = arith.addf %189, %190 : vector<8x32xf32>
    %192 = math.tanh %191 : vector<8x32xf32>
    %193 = arith.mulf %188, %192 : vector<8x32xf32>
    %194 = arith.truncf %193 : vector<8x32xf32> to vector<8x32xbf16>
    %195 = arith.index_cast %c4_i32 : i32 to index
    %c0_52 = arith.constant 0 : index
    %c0_53 = arith.constant 0 : index
    %196 = vector.load %arg2[%195, %c0_52, %c0_53] : memref<6x8x32xf32, #tpu.memory_space<vmem>>, vector<1x8x32xf32>
    %197 = vector.shape_cast %196 : vector<1x8x32xf32> to vector<8x32xf32>
    %cst_54 = arith.constant 0.000000e+00 : f32
    %198 = vector.broadcast %cst_54 : f32 to vector<8x32xf32>
    %199 = arith.cmpf one, %197, %198 : vector<8x32xf32>
    %200 = arith.select %199, %194, %160 : vector<8x32xi1>, vector<8x32xbf16>
    %201 = arith.select %199, %191, %161 : vector<8x32xi1>, vector<8x32xf32>
    %c5_i32 = arith.constant 5 : i32
    %202 = arith.index_cast %c5_i32 : i32 to index
    %c0_55 = arith.constant 0 : index
    %c0_56 = arith.constant 0 : index
    %203 = vector.load %arg1[%202, %c0_55, %c0_56] : memref<6x8x128xbf16, #tpu.memory_space<vmem>>, vector<1x8x128xbf16>
    %204 = vector.shape_cast %203 : vector<1x8x128xbf16> to vector<8x128xbf16>
    %205 = arith.extf %204 : vector<8x128xbf16> to vector<8x128xf32>
    %c0_57 = arith.constant 0 : index
    %c0_58 = arith.constant 0 : index
    %206 = vector.load %arg3[%c0_57, %c0_58] : memref<32x128xbf16, #tpu.memory_space<vmem>>, vector<32x128xbf16>
    %cst_59 = arith.constant dense<0.000000e+00> : vector<8x128xf32>
    %207 = tpu.matmul %200, %206, %cst_59 {dimension_numbers = #tpu.dot_dimension_numbers<[1], [0], [0], [1], [0, 0, 1, 1], [], []>} : vector<8x32xbf16>, vector<32x128xbf16>, vector<8x128xf32> -> vector<8x128xf32>
    %208 = arith.addf %205, %207 : vector<8x128xf32>
    %209 = vector.extract_strided_slice %208 {offsets = [0, 0], sizes = [8, 32], strides = [1, 1]} : vector<8x128xf32> to vector<8x32xf32>
    %210 = arith.negf %209 : vector<8x32xf32>
    %211 = math.exp %210 : vector<8x32xf32>
    %cst_60 = arith.constant 1.000000e+00 : f32
    %212 = vector.broadcast %cst_60 : f32 to vector<8x32xf32>
    %213 = arith.addf %212, %211 : vector<8x32xf32>
    %214 = arith.divf %212, %213 : vector<8x32xf32>
    %215 = vector.extract_strided_slice %208 {offsets = [0, 32], sizes = [8, 32], strides = [1, 1]} : vector<8x128xf32> to vector<8x32xf32>
    %216 = arith.negf %215 : vector<8x32xf32>
    %217 = math.exp %216 : vector<8x32xf32>
    %cst_61 = arith.constant 1.000000e+00 : f32
    %218 = vector.broadcast %cst_61 : f32 to vector<8x32xf32>
    %219 = arith.addf %218, %217 : vector<8x32xf32>
    %220 = arith.divf %218, %219 : vector<8x32xf32>
    %221 = vector.extract_strided_slice %208 {offsets = [0, 64], sizes = [8, 32], strides = [1, 1]} : vector<8x128xf32> to vector<8x32xf32>
    %222 = math.tanh %221 : vector<8x32xf32>
    %223 = vector.extract_strided_slice %208 {offsets = [0, 96], sizes = [8, 32], strides = [1, 1]} : vector<8x128xf32> to vector<8x32xf32>
    %224 = arith.negf %223 : vector<8x32xf32>
    %225 = math.exp %224 : vector<8x32xf32>
    %cst_62 = arith.constant 1.000000e+00 : f32
    %226 = vector.broadcast %cst_62 : f32 to vector<8x32xf32>
    %227 = arith.addf %226, %225 : vector<8x32xf32>
    %228 = arith.divf %226, %227 : vector<8x32xf32>
    %229 = arith.mulf %220, %201 : vector<8x32xf32>
    %230 = arith.mulf %214, %222 : vector<8x32xf32>
    %231 = arith.addf %229, %230 : vector<8x32xf32>
    %232 = math.tanh %231 : vector<8x32xf32>
    %233 = arith.mulf %228, %232 : vector<8x32xf32>
    %234 = arith.truncf %233 : vector<8x32xf32> to vector<8x32xbf16>
    %235 = arith.index_cast %c5_i32 : i32 to index
    %c0_63 = arith.constant 0 : index
    %c0_64 = arith.constant 0 : index
    %236 = vector.load %arg2[%235, %c0_63, %c0_64] : memref<6x8x32xf32, #tpu.memory_space<vmem>>, vector<1x8x32xf32>
    %237 = vector.shape_cast %236 : vector<1x8x32xf32> to vector<8x32xf32>
    %cst_65 = arith.constant 0.000000e+00 : f32
    %238 = vector.broadcast %cst_65 : f32 to vector<8x32xf32>
    %239 = arith.cmpf one, %237, %238 : vector<8x32xf32>
    %240 = arith.select %239, %234, %200 : vector<8x32xi1>, vector<8x32xbf16>
    %241 = arith.select %239, %231, %201 : vector<8x32xi1>, vector<8x32xf32>
    %c6_i32 = arith.constant 6 : i32
    %242 = arith.extf %240 : vector<8x32xbf16> to vector<8x32xf32>
    %c0_66 = arith.constant 0 : index
    %c0_67 = arith.constant 0 : index
    %243 = vector.load %arg4[%c0_66, %c0_67] : memref<32x128xf32, #tpu.memory_space<vmem>>, vector<32x128xf32>
    %cst_68 = arith.constant dense<0.000000e+00> : vector<8x128xf32>
    %244 = tpu.matmul %242, %243, %cst_68 {dimension_numbers = #tpu.dot_dimension_numbers<[1], [0], [0], [1], [0, 0, 1, 1], [], []>} : vector<8x32xf32>, vector<32x128xf32>, vector<8x128xf32> -> vector<8x128xf32>
    %c0_69 = arith.constant 0 : index
    %c0_70 = arith.constant 0 : index
    %245 = vector.load %arg5[%c0_69, %c0_70] : memref<1x128xf32, #tpu.memory_space<vmem>>, vector<1x128xf32>
    %246 = vector.broadcast %245 : vector<1x128xf32> to vector<8x128xf32>
    %247 = arith.addf %244, %246 : vector<8x128xf32>
    %cst_71 = arith.constant dense<0xFF800000> : vector<8xf32>
    %248 = vector.multi_reduction <maximumf>, %247, %cst_71 [1] : vector<8x128xf32> to vector<8xf32>
    %249 = vector.shape_cast %248 : vector<8xf32> to vector<8x1xf32>
    %250 = vector.broadcast %249 : vector<8x1xf32> to vector<8x128xf32>
    %251 = arith.subf %247, %250 : vector<8x128xf32>
    %252 = math.exp %251 : vector<8x128xf32>
    %cst_72 = arith.constant dense<0.000000e+00> : vector<8xf32>
    %253 = vector.multi_reduction <add>, %252, %cst_72 [1] : vector<8x128xf32> to vector<8xf32>
    %254 = vector.shape_cast %253 : vector<8xf32> to vector<8x1xf32>
    %255 = vector.broadcast %254 : vector<8x1xf32> to vector<8x128xf32>
    %256 = arith.divf %252, %255 : vector<8x128xf32>
    %c0_73 = arith.constant 0 : index
    %c0_74 = arith.constant 0 : index
    %257 = vector.load %arg6[%c0_73, %c0_74] : memref<8x128xf32, #tpu.memory_space<vmem>>, vector<8x128xf32>
    tpu.vector_store %arg6[%c0_73, %c0_74], %256 {strides = array<i32>} : memref<8x128xf32, #tpu.memory_space<vmem>>, vector<8x128xf32>,
    %c0_75 = arith.constant 0 : index
    %c0_76 = arith.constant 0 : index
    %258 = vector.load %arg7[%c0_75, %c0_76] : memref<8x32xf32, #tpu.memory_space<vmem>>, vector<8x32xf32>
    tpu.vector_store %arg7[%c0_75, %c0_76], %242 {strides = array<i32>} : memref<8x32xf32, #tpu.memory_space<vmem>>, vector<8x32xf32>,
    %c0_77 = arith.constant 0 : index
    %c0_78 = arith.constant 0 : index
    %259 = vector.load %arg8[%c0_77, %c0_78] : memref<8x32xf32, #tpu.memory_space<vmem>>, vector<8x32xf32>
    tpu.vector_store %arg8[%c0_77, %c0_78], %241 {strides = array<i32>} : memref<8x32xf32, #tpu.memory_space<vmem>>, vector<8x32xf32>,
    return
  }
  func.func @transform_0(%arg0: i32) -> (i32, i32, i32) {
    %c0_i32 = arith.constant 0 : i32
    %c0_i32_0 = arith.constant 0 : i32
    %c0_i32_1 = arith.constant 0 : i32
    %c0_i32_2 = arith.constant 0 : i32
    return %c0_i32, %c0_i32_0, %c0_i32_1 : i32, i32, i32
  }
  func.func @transform_1(%arg0: i32) -> (i32, i32, i32) {
    %c0_i32 = arith.constant 0 : i32
    %c0_i32_0 = arith.constant 0 : i32
    %c0_i32_1 = arith.constant 0 : i32
    %c0_i32_2 = arith.constant 0 : i32
    return %c0_i32, %c0_i32_0, %c0_i32_1 : i32, i32, i32
  }
  func.func @transform_2(%arg0: i32) -> (i32, i32) {
    %c0_i32 = arith.constant 0 : i32
    %c0_i32_0 = arith.constant 0 : i32
    %c0_i32_1 = arith.constant 0 : i32
    return %c0_i32, %c0_i32_0 : i32, i32
  }
  func.func @transform_3(%arg0: i32) -> (i32, i32) {
    %c0_i32 = arith.constant 0 : i32
    %c0_i32_0 = arith.constant 0 : i32
    %c0_i32_1 = arith.constant 0 : i32
    return %c0_i32, %c0_i32_0 : i32, i32
  }
  func.func @transform_4(%arg0: i32) -> (i32, i32) {
    %c0_i32 = arith.constant 0 : i32
    %c0_i32_0 = arith.constant 0 : i32
    %c0_i32_1 = arith.constant 0 : i32
    return %c0_i32, %c0_i32_0 : i32, i32
  }
  func.func @transform_5(%arg0: i32) -> (i32, i32) {
    %c0_i32 = arith.constant 0 : i32
    %c0_i32_0 = arith.constant 0 : i32
    %c0_i32_1 = arith.constant 0 : i32
    return %c0_i32, %c0_i32_0 : i32, i32
  }
  func.func @transform_6(%arg0: i32) -> (i32, i32) {
    %c0_i32 = arith.constant 0 : i32
    %c0_i32_0 = arith.constant 0 : i32
    %c0_i32_1 = arith.constant 0 : i32
    return %c0_i32, %c0_i32_0 : i32, i32
  }
  func.func @transform_7(%arg0: i32) -> (i32, i32) {
    %c0_i32 = arith.constant 0 : i32
    %c0_i32_0 = arith.constant 0 : i32
    %c0_i32_1 = arith.constant 0 : i32
    return %c0_i32, %c0_i32_0 : i32, i32
  }
}

</mosaic_0001>

<bundles_post_ra>
// kernel: tpu_custom_call.1
= control target key start
LH: loop header
LB: loop body
LE: loop exit
PB: predicated region body
PF: predicated region fallthrough
CT: control target
= control target key end

     0   :  { %13 = vsyncpa [#allocation3], 0  ;;  %s1194_s0 = inlined_call_operand.hbm [shape: bf16[6,8,128], index: 0, kind: input, shape index: {}]   ;;  %s1195_s1 = inlined_call_operand.hbm [shape: f32[6,8,32], index: 1, kind: input, shape index: {}]   ;;  %s1196_s2 = inlined_call_operand.hbm [shape: bf16[32,128], index: 2, kind: input, shape index: {}]   ;;  %s1197_s3 = inlined_call_operand.hbm [shape: f32[32,128], index: 3, kind: input, shape index: {}]   ;;  %s1198_s4 = inlined_call_operand.vmem [shape: f32[1,128], index: 4, kind: input, shape index: {}]   ;;  %s1199_s5 = inlined_call_operand.hbm [shape: f32[8,128], index: 5, kind: output, shape index: {0}]   ;;  %s1200_s6 = inlined_call_operand.hbm [shape: f32[8,32], index: 6, kind: output, shape index: {1}]   ;;  %s1201_s7 = inlined_call_operand.hbm [shape: f32[8,32], index: 7, kind: output, shape index: {2}]  }
   0x1   :  { %14 = vsyncpa [#allocation6], 0 }
   0x2   :  { %15 = vsyncpa [#allocation9], 0 }
   0x3   :  { %16 = vsyncpa [#allocation4], 0  ;;  %s35_s26 = sshll.u32 %s1195_s1, 4  ;;  %s36_s26 = int_to_ptr.hbm [resolvable:$true] %s35_s26 }
   0x4   :  { %17 = vsyncpa [#allocation12], 0  ;;  %s996_s27 = smov [#allocation5]   ;;  %s22_s8 = sshll.u32 %s1194_s0, 4  ;;  %s23_s8 = int_to_ptr.hbm [resolvable:$true] %s22_s8 }
   0x5   :  { %s37_s28 = sshll.u32 %s996_s27, 4  ;;  %s997_s9 = smov 128   ;;  %s38_s28 = int_to_ptr.vmem [resolvable:$true] %s37_s28 }
   0x6   :  { %s998_s10 = smov 8   ;;  %s999_s11 = smov [#allocation2]  }
   0x7   :  { %43 = dma.hbm_to_vmem [thread:$0]  %s36_s26, 768, %s38_s28, [#allocation6], %s997_s9, %s997_s9, %s998_s10  }
   0x8   :  { %s24_s12 = sshll.u32 %s999_s11, 4  ;;  %s1000_s13 = smov 64   ;;  %s25_s12 = int_to_ptr.vmem [resolvable:$true] %s24_s12 }
   0x9   :  { %s1001_s14 = smov 4   ;;  %s48_s16 = sshll.u32 %s1196_s2, 4  ;;  %s49_s16 = int_to_ptr.hbm [resolvable:$true] %s48_s16 }
   0xa   :  { %30 = dma.hbm_to_vmem [thread:$0]  %s23_s8, 384, %s25_s12, [#allocation3], %s1000_s13, %s1000_s13, %s1001_s14  }
   0xb   :  { %s1002_s17 = smov [#allocation7]   ;;  %s61_s20 = sshll.u32 %s1197_s3, 4  ;;  %s62_s20 = int_to_ptr.hbm [resolvable:$true] %s61_s20 }
   0xc   :  { %s50_s18 = sshll.u32 %s1002_s17, 4  ;;  %s1003_s21 = smov [#allocation8]   ;;  %s51_s18 = int_to_ptr.vmem [resolvable:$true] %s50_s18 }
   0xd   :  { %56 = dma.hbm_to_vmem [thread:$0]  %s49_s16, 256, %s51_s18, [#allocation6], %s1000_s13, %s1000_s13, %s1001_s14  }
   0xe   :  { %s63_s22 = sshll.u32 %s1003_s21, 4  ;;  %s64_s22 = int_to_ptr.vmem [resolvable:$true] %s63_s22 }
   0xf   :  { %69 = dma.hbm_to_vmem [thread:$0]  %s62_s20, 512, %s64_s22, [#allocation9], %s997_s9, %s997_s9, %s998_s10  }
  0x10   :  { %986 = dma.done.wait [#allocation3], 384  }
  0x11   :  { %987 = vsyncadd [#allocation3], 4294966912 }
  0x12   :  { %988 = dma.done.wait [#allocation6], 1024  }
  0x13   :  { %989 = vsyncadd [#allocation6], 4294966272 }
  0x14   :  { %990 = dma.done.wait [#allocation9], 512  }
  0x15   :  { %991 = vsyncadd [#allocation9], 4294966784  ;;  %v750_v0 = vld [vmem:[#allocation7 + $0x8] sm:$0xff]  ;;  %v749_v1 = vld [vmem:[#allocation7] sm:$0xff]  ;;  %v1004_v2 = vmov 0   ;;  %s1005_s2 = smov 32  }
  0x16   :  { %119 = vmatpush.bf16.msra.mxu0 %v750_v0  ;;  %201 = vmatpush.bf16.msra.mxu1 %v750_v0  ;;  %v1067_v3 = vld [vmem:[#allocation2] sm:$0xff]   ;;  %v165_v27 = vld [vmem:[#allocation5] sm:$0xff]  ;;  %s1006_s3 = smov 96   ;;  %v1078_v32 = vunpack.c.l.b16 %v1004_v2  ;;  %v1081_v33 = vunpack.c.h.b16 %v1004_v2  ;;  %vm109_vm9 = vcmask 261120   ;;  %s697_s27 = sshll.u32 %s1200_s6, 4  ;;  %s698_s27 = int_to_ptr.hbm [resolvable:$true] %s697_s27 }
  0x17   :  { %288 = vmatpush.bf16.msra.mxu2 %v750_v0  ;;  %375 = vmatpush.bf16.msra.mxu3 %v750_v0  ;;  %v92_v4 = vunpack.c.l.bf16 %v1067_v3  ;;  %vm166_vm4 = vcmp.ne.f32.partialorder %v165_v27, 0.0  ;;  %v186_v44 = vunpack.c.h.bf16 %v1067_v3  ;;  %s1007_s28 = smov [#allocation11]   ;;  %s1008_s30 = smov [#allocation13]  }
  0x18   :  { %vm167_vm5 = vmpackc.low %vm166_vm4, %vm166_vm4  ;;  %s695_s29 = sshll.u32 %s1007_s28, 4  ;;  %s708_s10 = sshll.u32 %s1201_s7, 4  ;;  %s696_s29 = int_to_ptr.vmem [resolvable:$true] %s695_s29  ;;  %s709_s10 = int_to_ptr.hbm [resolvable:$true] %s708_s10 }
  0x19   :  { %v168_v29 = vsel %vm167_vm5, 65537, %v1004_v2  ;;  %s1009_s6 = smov [#allocation10]  }
  0x1a   :  { %120 = vmatpush.bf16.msra.mxu0 %v749_v1  ;;  %202 = vmatpush.bf16.msra.mxu1 %v749_v1  ;;  %s684_s11 = sshll.u32 %s1009_s6, 4  ;;  %s685_s11 = int_to_ptr.vmem [resolvable:$true] %s684_s11 }
  0x1b   :  { %289 = vmatpush.bf16.msra.mxu2 %v749_v1  ;;  %376 = vmatpush.bf16.msra.mxu3 %v749_v1 }
  0x1d   :  { %121 = vmatmul.bf16.vlgmr.msra.gmra.mxu0 %v1004_v2 }
  0x1e   :  { %462 = vmatpush.bf16.msrb.mxu0 %v750_v0  ;;  %549 = vmatpush.bf16.msrb.mxu1 %v750_v0  ;;  %v252_v0 = vld [vmem:[#allocation5 + $0x8] sm:$0xff] }
  0x1f   :  { %vm253_vm14 = vcmp.ne.f32.partialorder %v252_v0, 0.0 }
  0x20   :  { %vm254_vm15 = vmpackc.low %vm253_vm14, %vm253_vm14 }
  0x22   :  { %463 = vmatpush.bf16.msrb.mxu0 %v749_v1  ;;  %550 = vmatpush.bf16.msrb.mxu1 %v749_v1  ;;  %v255_v1 = vsel %vm254_vm15, 65537, %v1004_v2 }
  0x9a   :  { %v122_v5 = vpop.f32.mrf.mxu0 }
  0x9b   :  { %v126_v6 = vadd.f32 %v122_v5, %v92_v4 }
  0x9d   :  { %766 = vtanh.f32 %v126_v6  ;;  %v737_v9 = vmul.f32 -1.442695, %v126_v6 }
  0x9f   :  { %768 = vpow2.f32 %v737_v9 }
  0xa2   :  { %v124_v7 = vpop.f32.mrf.mxu0 }
  0xa3   :  { %v767_v8 = vpop.eup %766 }
  0xa4   :  { %149 = vrot.lane.b32.xlu0 %v767_v8, %s1000_s13 }
  0xa5   :  { %v769_v10 = vpop.eup %768 }
  0xa6   :  { %v130_v11 = vadd.f32 1.0, %v769_v10 }
  0xa8   :  { %770 = vrcp.f32 %v130_v11  ;;  %v142_v17 = vand.u32 2147483648, %v130_v11  ;;  %vm136_vm1 = vweird.f32 %v130_v11  ;;  %v140_v18 = vand.u32 2147483647, %v130_v11 }
  0xaa   :  { %v143_v20 = vor.u32 1.1754944e-38, %v142_v17  ;;  %vm141_vm3 = vcmp.eq.f32.partialorder %v140_v18, 8.507059e+37 }
  0xae   :  { %v771_v12 = vpop.eup %770 }
  0xaf   :  { %v132_v13 = vmul.f32 %v771_v12, %v130_v11  ;;  %vm137_vm0 = vweird.f32 %v771_v12 }
  0xb0   :  { %vm138_vm2 = vmor %vm136_vm1, %vm137_vm0 }
  0xb1   :  { %v133_v14 = vsub.f32 1.0, %v132_v13 }
  0xb3   :  { %v134_v15 = vmul.f32 %v771_v12, %v133_v14 }
  0xb5   :  { %v135_v16 = vadd.f32 %v771_v12, %v134_v15 }
  0xb7   :  { %v139_v19 = vsel %vm138_vm2, %v771_v12, %v135_v16 }
  0xb8   :  { %v144_v22 = vsel %vm141_vm3, %v143_v20, %v139_v19  ;;  %v1109_v20 = vld [vmem:[#allocation2 + $0x8] sm:$0xff]  }
  0xb9   :  { %v147_v24 = vmul.f32 0.0, %v144_v22 }
 0x116   :  { %v150_v21 = vpop.permute.xlu0 %149 }
 0x117   :  { %v152_v23 = vmul.f32 %v150_v21, %v144_v22  ;;  %v273_v21 = vunpack.c.l.bf16 %v1109_v20 }
 0x119   :  { %154 = vrot.lane.b32.xlu0 %v152_v23, %s1005_s2 }
 0x18b   :  { %v155_v25 = vpop.permute.xlu0 %154 }
 0x18c   :  { %v157_v26 = vadd.f32 %v155_v25, %v147_v24 }
 0x18e   :  { %772 = vtanh.f32 %v157_v26 }
 0x194   :  { %v773_v28 = vpop.eup %772 }
 0x195   :  { %160 = vrot.lane.b32.xlu1 %v773_v28, %s1000_s13 }
 0x19d   :  { %169 = vrot.lane.b32.xlu1 %v168_v29, %s1006_s3 }
 0x207   :  { %v161_v30 = vpop.permute.xlu1 %160 }
 0x208   :  { %v163_v31 = vmul.f32 %v161_v30, %v144_v22 }
 0x20a   :  { %v164_v37 = vpack.c.bf16 %v163_v31, %v163_v31 }
 0x20f   :  { %v170_v34 = vpop.permute.xlu1 %169 }
 0x210   :  { %v171_v35 = vunpack.c.l.b16 %v170_v34  ;;  %v172_v36 = vunpack.c.h.b16 %v170_v34 }
 0x212   :  { %vm175_vm6 = vcmp.ne.s32.totalorder %v171_v35, %v1078_v32  ;;  %vm176_vm7 = vcmp.ne.s32.totalorder %v172_v36, %v1081_v33 }
 0x213   :  { %vm177_vm8 = vmpackc.low %vm176_vm7, %vm175_vm6 }
 0x214   :  { %v1085_v38 = vsel %vm177_vm8, %v164_v37, 0 }
 0x215   :  { %v188_v39 = vunpack.c.l.b16 %v1085_v38 }
 0x217   :  { %v189_v40 = vpack.c.b16 %v188_v39, %v188_v39 }
 0x219   :  { %190 = vrot.lane.b32.xlu2 %v189_v40, %s1005_s2 }
 0x221   :  { %180 = vrot.lane.b32.xlu2 %v157_v26, %s1006_s3 }
 0x273   :  { %v191_v41 = vpop.permute.xlu2 %190 }
 0x274   :  { %738 = vmatmul.msk.bf16.vlgmr.msra.gmra.mxu1 %vm109_vm9, %v191_v41 }
 0x27b   :  { %v181_v42 = vpop.permute.xlu2 %180 }
 0x27c   :  { %v183_v43 = vsel %vm166_vm4, %v181_v42, 0.0 }
 0x27d   :  { %230 = vrot.lane.b32.xlu1 %v183_v43, %s1005_s2 }
 0x285   :  { %256 = vrot.lane.b32.xlu1 %v255_v1, %s1006_s3 }
 0x2ef   :  { %v231_v3 = vpop.permute.xlu1 %230 }
 0x2f1   :  { %v204_v45 = vpop.f32.mrf.mxu1 }
 0x2f2   :  { %v208_v46 = vadd.f32 %v204_v45, %v186_v44 }
 0x2f4   :  { %774 = vtanh.f32 %v208_v46  ;;  %v739_v49 = vmul.f32 -1.442695, %v208_v46 }
 0x2f6   :  { %776 = vpow2.f32 %v739_v49 }
 0x2f7   :  { %v257_v8 = vpop.permute.xlu1 %256 }
 0x2f8   :  { %v258_v9 = vunpack.c.l.b16 %v257_v8  ;;  %v259_v10 = vunpack.c.h.b16 %v257_v8 }
 0x2f9   :  { %v206_v47 = vpop.f32.mrf.mxu1 }
 0x2fa   :  { %v775_v48 = vpop.eup %774  ;;  %vm262_vm0 = vcmp.ne.s32.totalorder %v258_v9, %v1078_v32  ;;  %vm263_vm1 = vcmp.ne.s32.totalorder %v259_v10, %v1081_v33 }
 0x2fb   :  { %235 = vrot.lane.b32.xlu0 %v775_v48, %s1000_s13  ;;  %vm264_vm2 = vmpackc.low %vm263_vm1, %vm262_vm0 }
 0x2fc   :  { %v777_v50 = vpop.eup %776 }
 0x2fd   :  { %v212_v51 = vadd.f32 1.0, %v777_v50 }
 0x2ff   :  { %778 = vrcp.f32 %v212_v51  ;;  %v224_v57 = vand.u32 2147483648, %v212_v51  ;;  %vm218_vm11 = vweird.f32 %v212_v51  ;;  %v222_v58 = vand.u32 2147483647, %v212_v51 }
 0x301   :  { %v225_v60 = vor.u32 1.1754944e-38, %v224_v57  ;;  %vm223_vm13 = vcmp.eq.f32.partialorder %v222_v58, 8.507059e+37 }
 0x305   :  { %v779_v52 = vpop.eup %778 }
 0x306   :  { %v214_v53 = vmul.f32 %v779_v52, %v212_v51  ;;  %vm219_vm10 = vweird.f32 %v779_v52 }
 0x307   :  { %vm220_vm12 = vmor %vm218_vm11, %vm219_vm10 }
 0x308   :  { %v215_v54 = vsub.f32 1.0, %v214_v53 }
 0x30a   :  { %v216_v55 = vmul.f32 %v779_v52, %v215_v54 }
 0x30c   :  { %v217_v56 = vadd.f32 %v779_v52, %v216_v55 }
 0x30e   :  { %v221_v59 = vsel %vm220_vm12, %v779_v52, %v217_v56 }
 0x30f   :  { %v226_v62 = vsel %vm223_vm13, %v225_v60, %v221_v59 }
 0x310   :  { %v233_v4 = vmul.f32 %v231_v3, %v226_v62 }
 0x36d   :  { %v236_v61 = vpop.permute.xlu0 %235 }
 0x36e   :  { %v238_v63 = vmul.f32 %v236_v61, %v226_v62 }
 0x370   :  { %240 = vrot.lane.b32.xlu2 %v238_v63, %s1005_s2 }
 0x3ca   :  { %v241_v5 = vpop.permute.xlu2 %240 }
 0x3cb   :  { %v243_v6 = vadd.f32 %v241_v5, %v233_v4 }
 0x3cd   :  { %780 = vtanh.f32 %v243_v6 }
 0x3d3   :  { %v781_v7 = vpop.eup %780 }
 0x3d4   :  { %246 = vrot.lane.b32.xlu0 %v781_v7, %s1000_s13  ;;  %v426_v7 = vld [vmem:[#allocation5 + $0x18] sm:$0xff] }
 0x3d5   :  { %vm427_vm13 = vcmp.ne.f32.partialorder %v426_v7, 0.0 }
 0x3dc   :  { %267 = vrot.lane.b32.xlu0 %v243_v6, %s1006_s3 }
 0x446   :  { %v247_v11 = vpop.permute.xlu0 %246 }
 0x447   :  { %v249_v12 = vmul.f32 %v247_v11, %v226_v62  ;;  %v360_v62 = vunpack.c.h.bf16 %v1109_v20 }
 0x449   :  { %v250_v13 = vpack.c.bf16 %v249_v12, %v249_v12 }
 0x44b   :  { %v265_v14 = vsel %vm264_vm2, %v250_v13, %v1085_v38 }
 0x44c   :  { %v275_v15 = vunpack.c.l.b16 %v265_v14 }
 0x44e   :  { %v276_v16 = vpack.c.b16 %v275_v15, %v275_v15  ;;  %v268_v17 = vpop.permute.xlu0 %267 }
 0x44f   :  { %v270_v18 = vsel %vm253_vm14, %v268_v17, %v183_v43  ;;  %v339_v43 = vld [vmem:[#allocation5 + $0x10] sm:$0xff]  ;;  %vm428_vm14 = vmpackc.low %vm427_vm13, %vm427_vm13 }
 0x450   :  { %277 = vrot.lane.b32.xlu2 %v276_v16, %s1005_s2  ;;  %vm340_vm7 = vcmp.ne.f32.partialorder %v339_v43, 0.0  ;;  %v429_v8 = vsel %vm428_vm14, 65537, %v1004_v2 }
 0x451   :  { %vm341_vm8 = vmpackc.low %vm340_vm7, %vm340_vm7 }
 0x452   :  { %v342_v44 = vsel %vm341_vm8, 65537, %v1004_v2 }
 0x458   :  { %317 = vrot.lane.b32.xlu2 %v270_v18, %s1005_s2 }
 0x460   :  { %343 = vrot.lane.b32.xlu2 %v342_v44, %s1006_s3 }
 0x4aa   :  { %v278_v19 = vpop.permute.xlu2 %277 }
 0x4ab   :  { %740 = vmatmul.msk.bf16.vlgmr.msra.gmra.mxu2 %vm109_vm9, %v278_v19 }
 0x4b2   :  { %v318_v45 = vpop.permute.xlu2 %317 }
 0x4ba   :  { %v344_v50 = vpop.permute.xlu2 %343 }
 0x4bb   :  { %v345_v51 = vunpack.c.l.b16 %v344_v50  ;;  %v346_v52 = vunpack.c.h.b16 %v344_v50 }
 0x4bd   :  { %vm349_vm10 = vcmp.ne.s32.totalorder %v345_v51, %v1078_v32  ;;  %vm350_vm11 = vcmp.ne.s32.totalorder %v346_v52, %v1081_v33 }
 0x4be   :  { %vm351_vm12 = vmpackc.low %vm350_vm11, %vm349_vm10 }
 0x52e   :  { %v291_v22 = vpop.f32.mrf.mxu2 }
 0x52f   :  { %v295_v23 = vadd.f32 %v291_v22, %v273_v21 }
 0x531   :  { %782 = vtanh.f32 %v295_v23  ;;  %v741_v26 = vmul.f32 -1.442695, %v295_v23 }
 0x533   :  { %784 = vpow2.f32 %v741_v26 }
 0x536   :  { %v293_v24 = vpop.f32.mrf.mxu2 }
 0x537   :  { %v783_v25 = vpop.eup %782 }
 0x538   :  { %322 = vrot.lane.b32.xlu1 %v783_v25, %s1000_s13 }
 0x539   :  { %v785_v27 = vpop.eup %784 }
 0x53a   :  { %v299_v28 = vadd.f32 1.0, %v785_v27 }
 0x53c   :  { %786 = vrcp.f32 %v299_v28  ;;  %v311_v36 = vand.u32 2147483648, %v299_v28  ;;  %vm305_vm4 = vweird.f32 %v299_v28  ;;  %v309_v37 = vand.u32 2147483647, %v299_v28 }
 0x53e   :  { %v312_v39 = vor.u32 1.1754944e-38, %v311_v36  ;;  %vm310_vm6 = vcmp.eq.f32.partialorder %v309_v37, 8.507059e+37 }
 0x542   :  { %v787_v29 = vpop.eup %786 }
 0x543   :  { %v301_v30 = vmul.f32 %v787_v29, %v299_v28  ;;  %vm306_vm3 = vweird.f32 %v787_v29 }
 0x544   :  { %vm307_vm5 = vmor %vm305_vm4, %vm306_vm3 }
 0x545   :  { %v302_v31 = vsub.f32 1.0, %v301_v30 }
 0x547   :  { %v303_v34 = vmul.f32 %v787_v29, %v302_v31 }
 0x549   :  { %v304_v35 = vadd.f32 %v787_v29, %v303_v34 }
 0x54b   :  { %v308_v38 = vsel %vm307_vm5, %v787_v29, %v304_v35 }
 0x54c   :  { %v313_v41 = vsel %vm310_vm6, %v312_v39, %v308_v38 }
 0x54d   :  { %v320_v46 = vmul.f32 %v318_v45, %v313_v41 }
 0x5aa   :  { %v323_v40 = vpop.permute.xlu1 %322 }
 0x5ab   :  { %v325_v42 = vmul.f32 %v323_v40, %v313_v41  ;;  %v1141_v40 = vld [vmem:[#allocation2 + $0x10] sm:$0xff]  }
 0x5ad   :  { %327 = vrot.lane.b32.xlu0 %v325_v42, %s1005_s2 }
 0x61f   :  { %v328_v47 = vpop.permute.xlu0 %327 }
 0x620   :  { %v330_v48 = vadd.f32 %v328_v47, %v320_v46 }
 0x622   :  { %788 = vtanh.f32 %v330_v48 }
 0x628   :  { %v789_v49 = vpop.eup %788 }
 0x629   :  { %333 = vrot.lane.b32.xlu1 %v789_v49, %s1000_s13 }
 0x631   :  { %354 = vrot.lane.b32.xlu1 %v330_v48, %s1006_s3 }
 0x69b   :  { %v334_v53 = vpop.permute.xlu1 %333 }
 0x69c   :  { %v336_v54 = vmul.f32 %v334_v53, %v313_v41  ;;  %v447_v41 = vunpack.c.l.bf16 %v1141_v40 }
 0x69e   :  { %v337_v55 = vpack.c.bf16 %v336_v54, %v336_v54 }
 0x6a0   :  { %v352_v56 = vsel %vm351_vm12, %v337_v55, %v265_v14 }
 0x6a1   :  { %v362_v57 = vunpack.c.l.b16 %v352_v56 }
 0x6a3   :  { %v363_v58 = vpack.c.b16 %v362_v57, %v362_v57  ;;  %v355_v59 = vpop.permute.xlu1 %354 }
 0x6a4   :  { %v357_v60 = vsel %vm340_vm7, %v355_v59, %v270_v18 }
 0x6a5   :  { %364 = vrot.lane.b32.xlu0 %v363_v58, %s1005_s2 }
 0x6ad   :  { %404 = vrot.lane.b32.xlu0 %v357_v60, %s1005_s2 }
 0x6b5   :  { %430 = vrot.lane.b32.xlu0 %v429_v8, %s1006_s3 }
 0x717   :  { %v365_v61 = vpop.permute.xlu0 %364 }
 0x718   :  { %742 = vmatmul.msk.bf16.vlgmr.msra.gmra.mxu3 %vm109_vm9, %v365_v61  ;;  %v513_v61 = vld [vmem:[#allocation5 + $0x20] sm:$0xff] }
 0x719   :  { %vm514_vm11 = vcmp.ne.f32.partialorder %v513_v61, 0.0 }
 0x71a   :  { %vm515_vm12 = vmpackc.low %vm514_vm11, %vm514_vm11 }
 0x71f   :  { %v405_v21 = vpop.permute.xlu0 %404 }
 0x727   :  { %v431_v26 = vpop.permute.xlu0 %430 }
 0x728   :  { %v432_v27 = vunpack.c.l.b16 %v431_v26  ;;  %v433_v28 = vunpack.c.h.b16 %v431_v26 }
 0x72a   :  { %vm436_vm3 = vcmp.ne.s32.totalorder %v432_v27, %v1078_v32  ;;  %vm437_vm4 = vcmp.ne.s32.totalorder %v433_v28, %v1081_v33 }
 0x72b   :  { %vm438_vm5 = vmpackc.low %vm437_vm4, %vm436_vm3 }
 0x79b   :  { %v378_v63 = vpop.f32.mrf.mxu3 }
 0x79c   :  { %v382_v0 = vadd.f32 %v378_v63, %v360_v62  ;;  %v516_v62 = vsel %vm515_vm12, 65537, %v1004_v2 }
 0x79e   :  { %790 = vtanh.f32 %v382_v0  ;;  %v743_v4 = vmul.f32 -1.442695, %v382_v0 }
 0x7a0   :  { %792 = vpow2.f32 %v743_v4 }
 0x7a3   :  { %v380_v1 = vpop.f32.mrf.mxu3 }
 0x7a4   :  { %v791_v3 = vpop.eup %790 }
 0x7a5   :  { %409 = vrot.lane.b32.xlu2 %v791_v3, %s1000_s13 }
 0x7a6   :  { %v793_v5 = vpop.eup %792 }
 0x7a7   :  { %v386_v6 = vadd.f32 1.0, %v793_v5 }
 0x7a9   :  { %794 = vrcp.f32 %v386_v6  ;;  %v398_v14 = vand.u32 2147483648, %v386_v6  ;;  %vm392_vm0 = vweird.f32 %v386_v6  ;;  %v396_v15 = vand.u32 2147483647, %v386_v6 }
 0x7ab   :  { %v399_v17 = vor.u32 1.1754944e-38, %v398_v14  ;;  %vm397_vm2 = vcmp.eq.f32.partialorder %v396_v15, 8.507059e+37 }
 0x7af   :  { %v795_v9 = vpop.eup %794 }
 0x7b0   :  { %v388_v10 = vmul.f32 %v795_v9, %v386_v6  ;;  %vm393_vm15 = vweird.f32 %v795_v9 }
 0x7b1   :  { %vm394_vm1 = vmor %vm392_vm0, %vm393_vm15 }
 0x7b2   :  { %v389_v11 = vsub.f32 1.0, %v388_v10 }
 0x7b4   :  { %v390_v12 = vmul.f32 %v795_v9, %v389_v11 }
 0x7b6   :  { %v391_v13 = vadd.f32 %v795_v9, %v390_v12 }
 0x7b8   :  { %v395_v16 = vsel %vm394_vm1, %v795_v9, %v391_v13 }
 0x7b9   :  { %v400_v19 = vsel %vm397_vm2, %v399_v17, %v395_v16  ;;  %v534_v17 = vunpack.c.h.bf16 %v1141_v40 }
 0x7ba   :  { %v407_v22 = vmul.f32 %v405_v21, %v400_v19 }
 0x7ff   :  { %v410_v18 = vpop.permute.xlu2 %409 }
 0x800   :  { %v412_v20 = vmul.f32 %v410_v18, %v400_v19 }
 0x802   :  { %414 = vrot.lane.b32.xlu1 %v412_v20, %s1005_s2 }
 0x874   :  { %v415_v23 = vpop.permute.xlu1 %414 }
 0x875   :  { %v417_v24 = vadd.f32 %v415_v23, %v407_v22 }
 0x877   :  { %796 = vtanh.f32 %v417_v24 }
 0x87d   :  { %v797_v25 = vpop.eup %796 }
 0x87e   :  { %420 = vrot.lane.b32.xlu2 %v797_v25, %s1000_s13 }
 0x886   :  { %441 = vrot.lane.b32.xlu2 %v417_v24, %s1006_s3 }
 0x8d8   :  { %v421_v29 = vpop.permute.xlu2 %420 }
 0x8d9   :  { %v423_v30 = vmul.f32 %v421_v29, %v400_v19 }
 0x8db   :  { %v424_v31 = vpack.c.bf16 %v423_v30, %v423_v30 }
 0x8dd   :  { %v439_v34 = vsel %vm438_vm5, %v424_v31, %v352_v56 }
 0x8de   :  { %v449_v35 = vunpack.c.l.b16 %v439_v34 }
 0x8e0   :  { %v450_v36 = vpack.c.b16 %v449_v35, %v449_v35  ;;  %v442_v37 = vpop.permute.xlu2 %441 }
 0x8e1   :  { %v444_v38 = vsel %vm427_vm13, %v442_v37, %v357_v60 }
 0x8e2   :  { %451 = vrot.lane.b32.xlu1 %v450_v36, %s1005_s2 }
 0x8ea   :  { %491 = vrot.lane.b32.xlu1 %v444_v38, %s1005_s2 }
 0x8f2   :  { %517 = vrot.lane.b32.xlu1 %v516_v62, %s1006_s3 }
 0x954   :  { %v452_v39 = vpop.permute.xlu1 %451 }
 0x955   :  { %744 = vmatmul.msk.bf16.vlgmr.msrb.gmra.mxu0 %vm109_vm9, %v452_v39  ;;  %v600_v39 = vld [vmem:[#allocation5 + $0x28] sm:$0xff] }
 0x956   :  { %vm601_vm4 = vcmp.ne.f32.partialorder %v600_v39, 0.0 }
 0x957   :  { %vm602_vm5 = vmpackc.low %vm601_vm4, %vm601_vm4 }
 0x958   :  { %v603_v40 = vsel %vm602_vm5, 65537, %v1004_v2 }
 0x95c   :  { %v492_v63 = vpop.permute.xlu1 %491 }
 0x964   :  { %v518_v5 = vpop.permute.xlu1 %517 }
 0x965   :  { %v519_v6 = vunpack.c.l.b16 %v518_v5  ;;  %v520_v7 = vunpack.c.h.b16 %v518_v5 }
 0x967   :  { %vm523_vm13 = vcmp.ne.s32.totalorder %v519_v6, %v1078_v32  ;;  %vm524_vm14 = vcmp.ne.s32.totalorder %v520_v7, %v1081_v33 }
 0x968   :  { %vm525_vm15 = vmpackc.low %vm524_vm14, %vm523_vm13 }
 0x9d2   :  { %v465_v42 = vpop.f32.mrf.mxu0 }
 0x9d3   :  { %v469_v43 = vadd.f32 %v465_v42, %v447_v41 }
 0x9d5   :  { %798 = vtanh.f32 %v469_v43  ;;  %v745_v46 = vmul.f32 -1.442695, %v469_v43 }
 0x9d7   :  { %800 = vpow2.f32 %v745_v46  ;;  %v623_v46 = vld [vmem:[#allocation8 + $0x18] sm:$0xff] }
 0x9d8   :  { %645 = vmatpush.msrb.mxu2 %v623_v46 }
 0x9da   :  { %v467_v44 = vpop.f32.mrf.mxu0 }
 0x9db   :  { %v799_v45 = vpop.eup %798 }
 0x9dc   :  { %496 = vrot.lane.b32.xlu0 %v799_v45, %s1000_s13 }
 0x9dd   :  { %v801_v47 = vpop.eup %800 }
 0x9de   :  { %v473_v48 = vadd.f32 1.0, %v801_v47  ;;  %v622_v47 = vld [vmem:[#allocation8 + $0x10] sm:$0xff] }
 0x9df   :  { %646 = vmatpush.msrb.mxu2 %v622_v47 }
 0x9e0   :  { %802 = vrcp.f32 %v473_v48  ;;  %v485_v54 = vand.u32 2147483648, %v473_v48  ;;  %vm479_vm7 = vweird.f32 %v473_v48  ;;  %v483_v55 = vand.u32 2147483647, %v473_v48 }
 0x9e2   :  { %v486_v57 = vor.u32 1.1754944e-38, %v485_v54  ;;  %vm484_vm10 = vcmp.eq.f32.partialorder %v483_v55, 8.507059e+37 }
 0x9e6   :  { %v803_v49 = vpop.eup %802 }
 0x9e7   :  { %v475_v50 = vmul.f32 %v803_v49, %v473_v48  ;;  %vm480_vm6 = vweird.f32 %v803_v49  ;;  %v621_v48 = vld [vmem:[#allocation8 + $0x8] sm:$0xff] }
 0x9e8   :  { %vm481_vm8 = vmor %vm479_vm7, %vm480_vm6  ;;  %647 = vmatpush.msrb.mxu2 %v621_v48 }
 0x9e9   :  { %v476_v51 = vsub.f32 1.0, %v475_v50 }
 0x9eb   :  { %v477_v52 = vmul.f32 %v803_v49, %v476_v51 }
 0x9ed   :  { %v478_v53 = vadd.f32 %v803_v49, %v477_v52 }
 0x9ef   :  { %v482_v56 = vsel %vm481_vm8, %v803_v49, %v478_v53  ;;  %v620_v49 = vld [vmem:[#allocation8] sm:$0xff] }
 0x9f0   :  { %v487_v59 = vsel %vm484_vm10, %v486_v57, %v482_v56  ;;  %648 = vmatpush.msrb.mxu2 %v620_v49 }
 0x9f1   :  { %v494_v0 = vmul.f32 %v492_v63, %v487_v59 }
 0xa4e   :  { %v497_v58 = vpop.permute.xlu0 %496 }
 0xa4f   :  { %v499_v60 = vmul.f32 %v497_v58, %v487_v59 }
 0xa51   :  { %501 = vrot.lane.b32.xlu2 %v499_v60, %s1005_s2 }
 0xaab   :  { %v502_v1 = vpop.permute.xlu2 %501 }
 0xaac   :  { %v504_v3 = vadd.f32 %v502_v1, %v494_v0 }
 0xaae   :  { %804 = vtanh.f32 %v504_v3 }
 0xab4   :  { %v805_v4 = vpop.eup %804 }
 0xab5   :  { %507 = vrot.lane.b32.xlu0 %v805_v4, %s1000_s13 }
 0xabd   :  { %528 = vrot.lane.b32.xlu0 %v504_v3, %s1006_s3 }
 0xb27   :  { %v508_v8 = vpop.permute.xlu0 %507 }
 0xb28   :  { %v510_v9 = vmul.f32 %v508_v8, %v487_v59 }
 0xb2a   :  { %v511_v10 = vpack.c.bf16 %v510_v9, %v510_v9 }
 0xb2c   :  { %v1154_v11 = vsel %vm525_vm15, %v511_v10, %v439_v34 }
 0xb2d   :  { %v536_v12 = vunpack.c.l.b16 %v1154_v11 }
 0xb2f   :  { %v537_v13 = vpack.c.b16 %v536_v12, %v536_v12  ;;  %v529_v14 = vpop.permute.xlu0 %528 }
 0xb30   :  { %v1159_v15 = vsel %vm514_vm11, %v529_v14, %v444_v38 }
 0xb31   :  { %538 = vrot.lane.b32.xlu2 %v537_v13, %s1005_s2 }
 0xb39   :  { %578 = vrot.lane.b32.xlu2 %v1159_v15, %s1005_s2 }
 0xb41   :  { %604 = vrot.lane.b32.xlu2 %v603_v40, %s1006_s3 }
 0xb8b   :  { %v539_v16 = vpop.permute.xlu2 %538 }
 0xb8c   :  { %746 = vmatmul.msk.bf16.vlgmr.msrb.gmra.mxu1 %vm109_vm9, %v539_v16 }
 0xb93   :  { %v579_v41 = vpop.permute.xlu2 %578 }
 0xb9b   :  { %v605_v50 = vpop.permute.xlu2 %604 }
 0xb9c   :  { %v606_v2 = vunpack.c.l.b16 %v605_v50  ;;  %v607_v51 = vunpack.c.h.b16 %v605_v50 }
 0xb9e   :  { %vm610_vm6 = vcmp.ne.s32.totalorder %v606_v2, %v1078_v32  ;;  %vm611_vm7 = vcmp.ne.s32.totalorder %v607_v51, %v1081_v33  ;;  %v765_v33 = vld [vmem:[%s1198_s4] ss:$0 sm:$0xff]  ;;  %s706_s4 = sshll.u32 %s1008_s30, 4  ;;  %s707_s4 = int_to_ptr.vmem [resolvable:$true] %s706_s4 }
 0xb9f   :  { %vm612_vm8 = vmpackc.low %vm611_vm7, %vm610_vm6 }
 0xc09   :  { %v552_v18 = vpop.f32.mrf.mxu1 }
 0xc0a   :  { %v556_v19 = vadd.f32 %v552_v18, %v534_v17 }
 0xc0c   :  { %806 = vtanh.f32 %v556_v19  ;;  %v747_v22 = vmul.f32 -1.442695, %v556_v19 }
 0xc0e   :  { %808 = vpow2.f32 %v747_v22 }
 0xc11   :  { %v554_v20 = vpop.f32.mrf.mxu1 }
 0xc12   :  { %v807_v21 = vpop.eup %806 }
 0xc13   :  { %583 = vrot.lane.b32.xlu1 %v807_v21, %s1000_s13 }
 0xc14   :  { %v809_v23 = vpop.eup %808 }
 0xc15   :  { %v560_v24 = vadd.f32 1.0, %v809_v23 }
 0xc17   :  { %810 = vrcp.f32 %v560_v24  ;;  %v572_v30 = vand.u32 2147483648, %v560_v24  ;;  %vm566_vm1 = vweird.f32 %v560_v24  ;;  %v570_v31 = vand.u32 2147483647, %v560_v24 }
 0xc19   :  { %v573_v35 = vor.u32 1.1754944e-38, %v572_v30  ;;  %vm571_vm3 = vcmp.eq.f32.partialorder %v570_v31, 8.507059e+37 }
 0xc1d   :  { %v811_v25 = vpop.eup %810 }
 0xc1e   :  { %v562_v26 = vmul.f32 %v811_v25, %v560_v24  ;;  %vm567_vm0 = vweird.f32 %v811_v25 }
 0xc1f   :  { %vm568_vm2 = vmor %vm566_vm1, %vm567_vm0 }
 0xc20   :  { %v563_v27 = vsub.f32 1.0, %v562_v26 }
 0xc22   :  { %v564_v28 = vmul.f32 %v811_v25, %v563_v27 }
 0xc24   :  { %v565_v29 = vadd.f32 %v811_v25, %v564_v28 }
 0xc26   :  { %v569_v34 = vsel %vm568_vm2, %v811_v25, %v565_v29 }
 0xc27   :  { %v574_v37 = vsel %vm571_vm3, %v573_v35, %v569_v34 }
 0xc28   :  { %v581_v42 = vmul.f32 %v579_v41, %v574_v37 }
 0xc85   :  { %v584_v36 = vpop.permute.xlu1 %583 }
 0xc86   :  { %v586_v38 = vmul.f32 %v584_v36, %v574_v37 }
 0xc88   :  { %588 = vrot.lane.b32.xlu0 %v586_v38, %s1005_s2 }
 0xcfa   :  { %v589_v43 = vpop.permute.xlu0 %588 }
 0xcfb   :  { %v591_v44 = vadd.f32 %v589_v43, %v581_v42 }
 0xcfd   :  { %812 = vtanh.f32 %v591_v44 }
 0xd03   :  { %v813_v45 = vpop.eup %812 }
 0xd04   :  { %594 = vrot.lane.b32.xlu1 %v813_v45, %s1000_s13  ;;  %s686_s13 = sshll.u32 %s1199_s5, 4  ;;  %s687_s13 = int_to_ptr.hbm [resolvable:$true] %s686_s13 }
 0xd76   :  { %v595_v52 = vpop.permute.xlu1 %594 }
 0xd77   :  { %v597_v53 = vmul.f32 %v595_v52, %v574_v37 }
 0xd79   :  { %v598_v54 = vpack.c.bf16 %v597_v53, %v597_v53 }
 0xd7b   :  { %v613_v55 = vsel %vm612_vm8, %v598_v54, %v1154_v11 }
 0xd7c   :  { %v619_v56 = vunpack.c.l.bf16 %v613_v55 }
 0xd7e   :  { %629 = vrot.lane.b32.xlu0 %v619_v56, %s1005_s2 }
 0xd86   :  { %615 = vrot.lane.b32.xlu0 %v591_v44, %s1006_s3 }
 0xdf0   :  { %v630_v57 = vpop.permute.xlu0 %629 }
 0xdf1   :  { %677 = vst.msk [vmem:[#allocation11] sm:$0xff] %vm109_vm9, %v630_v57  ;;  %748 = vmatmul.msk.f32.vlgmr.msrb.gmra.mxu2 %vm109_vm9, %v630_v57 }
 0xdf2   :  { %700 = dma.vmem_to_hbm [thread:$0]  %s696_s29, 128, %s698_s27, [#allocation12]  }
 0xdf8   :  { %v616_v58 = vpop.permute.xlu0 %615 }
 0xdf9   :  { %v618_v32 = vsel %vm601_vm4, %v616_v58, %v1159_v15 }
 0xdfa   :  { %678 = vst.msk [vmem:[#allocation13] sm:$0xff] %vm109_vm9, %v618_v32 }
 0xdfb   :  { %711 = dma.vmem_to_hbm [thread:$0]  %s707_s4, 128, %s709_s10, [#allocation12]  }
 0xe74   :  { %v650_v59 = vpop.f32.mrf.mxu2 }
 0xe75   :  { %v651_v60 = vadd.f32 %v765_v33, %v650_v59 }
 0xe77   :  { %653 = vmax.xlane.f32.xlu1 %v651_v60 }
 0xeea   :  { %v654_v61 = vpop.xlane.xlu1 %653 }
 0xeeb   :  { %v655_v62 = vsub.f32 %v651_v60, %v654_v61 }
 0xeed   :  { %v656_v63 = vmul.f32 1.442695, %v655_v62 }
 0xeef   :  { %814 = vpow2.f32 %v656_v63 }
 0xef5   :  { %v815_v0 = vpop.eup %814 }
 0xef6   :  { %658 = vadd.xlane.f32.xlu2 %v815_v0 }
 0xf69   :  { %v659_v1 = vpop.xlane.xlu2 %658 }
 0xf6a   :  { %816 = vrcp.f32 %v659_v1  ;;  %v671_v6 = vand.u32 2147483648, %v659_v1  ;;  %v669_v8 = vand.u32 2147483647, %v659_v1  ;;  %vm665_vm10 = vweird.f32 %v659_v1 }
 0xf6c   :  { %v672_v10 = vor.u32 1.1754944e-38, %v671_v6  ;;  %vm670_vm12 = vcmp.eq.f32.partialorder %v669_v8, 8.507059e+37 }
 0xf70   :  { %v817_v3 = vpop.eup %816 }
 0xf71   :  { %v661_v4 = vmul.f32 %v817_v3, %v659_v1  ;;  %vm666_vm9 = vweird.f32 %v817_v3 }
 0xf72   :  { %vm667_vm11 = vmor %vm665_vm10, %vm666_vm9 }
 0xf73   :  { %v662_v5 = vsub.f32 1.0, %v661_v4 }
 0xf75   :  { %v663_v7 = vmul.f32 %v817_v3, %v662_v5 }
 0xf77   :  { %v664_v9 = vadd.f32 %v817_v3, %v663_v7 }
 0xf79   :  { %v668_v11 = vsel %vm667_vm11, %v817_v3, %v664_v9 }
 0xf7a   :  { %v673_v12 = vsel %vm670_vm12, %v672_v10, %v668_v11 }
 0xf7b   :  { %v674_v13 = vmul.f32 %v815_v0, %v673_v12 }
 0xf7d   :  { %675 = vst [vmem:[#allocation10] sm:$0xff] %v674_v13 }
 0xf7e   :  { %689 = dma.vmem_to_hbm [thread:$0]  %s685_s11, 128, %s687_s13, [#allocation4]  }
 0xf7f   :  { %992 = dma.done.wait [#allocation4], 128  }
 0xf80   :  { %993 = vsyncadd [#allocation4], 4294967168 }
 0xf81   :  { %994 = dma.done.wait [#allocation12], 256  }
 0xf82   :  { %995 = vsyncadd [#allocation12], 4294967040 }
 0xf83   :  { %724 = vsyncpa [#allocation3], 1 }
 0xf84   :  { %725 = vsyncpa [#allocation6], 1 }
 0xf85   :  { %726 = vsyncpa [#allocation9], 1 }
 0xf86   :  { %727 = vsyncpa [#allocation4], 1 }
 0xf87   :  { %728 = vsyncpa [#allocation12], 1 }

</bundles_post_ra>
